<compile_context>
chip_gen: v6e
topology: v6e:2x2x1
jax: 0.10.0
libtpu: 0.0.40
codegen_flags: <defaults>
</compile_context>

<pallas_src>
import functools
import math

import jax
import jax.numpy as jnp
from jax.experimental import pallas as pl
from jax.experimental.pallas import tpu as pltpu

LAMBDA_ZONE = 0.3  # matches nn.Module default


def _mod(idx, n):
    """idx % n, using a single bitwise AND when n is a power of two."""
    if (n & (n - 1)) == 0:
        return idx & (n - 1)
    return idx % n


def _zoning_block_kernel(logit_ref, target_ref, feat_ref, mask_ref, out_ref, *,
                         H, W, D, n_logit_grid, gate_bce, wx, wy, wz):
    HW = H * W
    R = feat_ref.shape[0]   # rows per block = TB * D (or D in the fallback path)

    f = feat_ref[...].astype(jnp.float32)   # (R, HW), lane-dense
    m = mask_ref[...].astype(jnp.float32)

    lane = jax.lax.broadcasted_iota(jnp.int32, (R, HW), 1)   # flat h*W + w
    row = jax.lax.broadcasted_iota(jnp.int32, (R, HW), 0)    # flat tb*D + d

    # One gradient direction at a time, each reduced to a scalar immediately,
    # so at most ~5 full-size f32 slabs are live at once (tiles stay spill-free).

    # W direction (PyTorch grad_y): neighbour = next lane; invalid at w == W-1.
    g = jnp.abs((pltpu.roll(f, HW - 1, axis=1) - f)
                * (pltpu.roll(m, HW - 1, axis=1) * m))
    zone = jnp.sum(jnp.where(_mod(lane, W) < W - 1, g, 0.0)) * wy

    # H direction (PyTorch grad_x): neighbour = W lanes ahead; invalid at h == H-1.
    g = jnp.abs((pltpu.roll(f, HW - W, axis=1) - f)
                * (pltpu.roll(m, HW - W, axis=1) * m))
    zone = zone + jnp.sum(jnp.where(lane < (H - 1) * W, g, 0.0)) * wx

    # D direction (PyTorch grad_z): neighbour = next row; invalid at d == D-1
    # (which also masks the cross-slab wrap between the TB sub-blocks).
    g = jnp.abs((pltpu.roll(f, R - 1, axis=0) - f)
                * (pltpu.roll(m, R - 1, axis=0) * m))
    zone = zone + jnp.sum(jnp.where(_mod(row, D) < D - 1, g, 0.0)) * wz

    # Lane-dense per-block output tile: sublane 0 = bce partial, 1 = zone partial.
    slot = jax.lax.broadcasted_iota(jnp.int32, (8, 128), 0)
    out_ref[...] = jnp.where(slot == 1, zone, 0.0)

    # BCEWithLogits partial sum.  Grid steps past the logits extent skip the
    # loads and all EUP work entirely; the clamped index_map already skips the DMA.
    def _bce():
        x = logit_ref[...].astype(jnp.float32)
        t = target_ref[...].astype(jnp.float32)
        bce = jnp.maximum(x, 0.0) - x * t + jnp.log(1.0 + jnp.exp(-jnp.abs(x)))
        out_ref[...] += jnp.where(slot == 0, jnp.sum(bce), 0.0)

    if gate_bce:
        pl.when(pl.program_id(0) < n_logit_grid)(_bce)
    else:
        _bce()


def _pick_tb(n_blocks, n_logit_blocks, slab_bytes):
    """Slabs per block: divides gcd(n_blocks, n_logit_blocks), keeps each input
    buffer <= ~2 MiB, and leaves >= 4 grid steps for megacore splitting."""
    g = math.gcd(n_blocks, n_logit_blocks)
    tb_cap = max(1, min((2 * 1024 * 1024) // max(slab_bytes, 1), n_blocks // 4))
    best = 1
    for tb in range(1, g + 1):
        if g % tb == 0 and tb <= tb_cap:
            best = tb
    return best


def zoning_aware_loss(logits, targets, features, masks, lambda_zone=LAMBDA_ZONE):
    """loss = mean(BCEWithLogits(logits, targets)) + lambda_zone * zone_loss.

    Inputs are NCDHW: features/masks (B, C, D, H, W); logits/targets
    (B, C_l, D, H, W).  Any dtype is accepted and passed straight through to
    the kernel (cast to f32 in-kernel), so producers should hand masks/targets
    as int8/bool and features as bf16 to cut HBM traffic (the kernel is
    HBM-bound on every TPU generation).
    """
    B, C, D, H, W = features.shape
    Bl, Cl, Dl, Hl, Wl = logits.shape
    assert (Bl, Dl, Hl, Wl) == (B, D, H, W), "logits must share B, D, H, W"
    assert targets.shape == logits.shape
    assert masks.shape == features.shape

    HW = H * W
    n_blocks = B * C
    n_logit_blocks = Bl * Cl
    assert 1 <= n_logit_blocks <= n_blocks

    # Mean normalizers with the /3 folded in (matches the PyTorch reference).
    wx = 1.0 / (3.0 * B * C * D * (H - 1) * W)   # gradient along H
    wy = 1.0 / (3.0 * B * C * D * H * (W - 1))   # gradient along W
    wz = 1.0 / (3.0 * B * C * (D - 1) * H * W)   # gradient along D

    itemsize = max(a.dtype.itemsize for a in (logits, targets, features, masks))

    if D % 8 == 0:
        # Lane-dense flattened layout: rows = B*C*D (sublanes), lanes = H*W.
        # A block is TB consecutive (D, H*W) slabs (free, metadata-only reshape).
        TB = _pick_tb(n_blocks, n_logit_blocks, D * HW * itemsize)
        f2 = features.reshape(n_blocks * D, HW)
        m2 = masks.reshape(n_blocks * D, HW)
        l2 = logits.reshape(n_logit_blocks * D, HW)
        t2 = targets.reshape(n_logit_blocks * D, HW)
        n_grid = n_blocks // TB
        n_logit_grid = n_logit_blocks // TB
        clamp = n_logit_grid - 1
        logit_spec = pl.BlockSpec((TB * D, HW),
                                  lambda i: (jnp.minimum(i, clamp), 0))
        slab_spec = pl.BlockSpec((TB * D, HW), lambda i: (i, 0))
    else:
        # Fallback for D not a multiple of 8: one (D, H*W) slab per step
        # (block last-two dims equal the full array dims, so always legal).
        TB = 1
        f2 = features.reshape(n_blocks, D, HW)
        m2 = masks.reshape(n_blocks, D, HW)
        l2 = logits.reshape(n_logit_blocks, D, HW)
        t2 = targets.reshape(n_logit_blocks, D, HW)
        n_grid = n_blocks
        n_logit_grid = n_logit_blocks
        clamp = n_logit_grid - 1
        logit_spec = pl.BlockSpec((None, D, HW),
                                  lambda i: (jnp.minimum(i, clamp), 0, 0))
        slab_spec = pl.BlockSpec((None, D, HW), lambda i: (i, 0, 0))

    kernel = functools.partial(
        _zoning_block_kernel, H=H, W=W, D=D, n_logit_grid=n_logit_grid,
        gate_bce=(n_logit_grid < n_grid), wx=wx, wy=wy, wz=wz)

    partials = pl.pallas_call(
        kernel,
        out_shape=jax.ShapeDtypeStruct((n_grid, 8, 128), jnp.float32),
        grid=(n_grid,),
        in_specs=[logit_spec, logit_spec, slab_spec, slab_spec],
        out_specs=pl.BlockSpec((None, 8, 128), lambda i: (i, 0, 0)),
        compiler_params=pltpu.CompilerParams(
            dimension_semantics=("parallel",),
            # <= 48 MiB: fits v7x's 64 MiB physical VMEM with headroom; the
            # ~2 MiB/buffer TB cap keeps 4 inputs x 2 buffers + temps well under.
            vmem_limit_bytes=48 * 1024 * 1024,
        ),
    )(l2, t2, f2, m2)

    bce_sum = jnp.sum(partials[:, 0, 0])
    zone_loss = jnp.sum(partials[:, 1, 0])
    main_loss = bce_sum / jnp.float32(logits.size)
    return main_loss + jnp.float32(lambda_zone) * zone_loss


def _reference(logits, targets, features, masks):
    x = logits.astype(jnp.float32)
    t = targets.astype(jnp.float32)
    bce = jnp.mean(jnp.maximum(x, 0.0) - x * t + jnp.log1p(jnp.exp(-jnp.abs(x))))
    f = features.astype(jnp.float32)
    m = masks.astype(jnp.float32)
    gx = f[:, :, :, 1:, :] - f[:, :, :, :-1, :]
    gy = f[:, :, :, :, 1:] - f[:, :, :, :, :-1]
    gz = f[:, :, 1:, :, :] - f[:, :, :-1, :, :]
    mx = m[:, :, :, 1:, :] * m[:, :, :, :-1, :]
    my = m[:, :, :, :, 1:] * m[:, :, :, :, :-1]
    mz = m[:, :, 1:, :, :] * m[:, :, :-1, :, :]
    zone = (jnp.mean(jnp.abs(gx * mx)) + jnp.mean(jnp.abs(gy * my))
            + jnp.mean(jnp.abs(gz * mz))) / 3.0
    return bce + LAMBDA_ZONE * zone


if __name__ == "__main__":
    key = jax.random.PRNGKey(0)
    k1, k2, k3, k4 = jax.random.split(key, 4)

    B, C, D, H, W = 2, 4, 8, 16, 16            # features / masks
    logits = jax.random.normal(k1, (B, 1, D, H, W), dtype=jnp.float32)
    targets = jax.random.bernoulli(k2, 0.5, (B, 1, D, H, W)).astype(jnp.float32)
    features = jax.random.normal(k3, (B, C, D, H, W), dtype=jnp.float32)
    masks = jax.random.bernoulli(k4, 0.7, (B, C, D, H, W)).astype(jnp.float32)

    loss = jax.jit(zoning_aware_loss)(logits, targets, features, masks)
    loss = jax.block_until_ready(loss)

    ref = _reference(logits, targets, features, masks)
    assert jnp.allclose(loss, ref, rtol=1e-5, atol=1e-5), (loss, ref)

    print("KERNEL_OK")
</pallas_src>

<mosaic_0001>
module attributes {stable_mosaic.version = 11 : i64} {
  func.func @_zoning_block_kernel(%arg0: i32, %arg1: memref<16x256xf32, #tpu.memory_space<vmem>>, %arg2: memref<16x256xf32, #tpu.memory_space<vmem>>, %arg3: memref<16x256xf32, #tpu.memory_space<vmem>>, %arg4: memref<16x256xf32, #tpu.memory_space<vmem>>, %arg5: memref<1x8x128xf32, #tpu.memory_space<vmem>>) attributes {dimension_semantics = [#tpu.dimension_semantics<parallel>], iteration_bounds = array<i64: 4>, scalar_prefetch = 0 : i64, scratch_operands = 0 : i64, tpu.core_type = #tpu.core_type<tc>, window_params = [{transform_indices = @transform_0, window_bounds = array<i64: 16, 256>}, {transform_indices = @transform_1, window_bounds = array<i64: 16, 256>}, {transform_indices = @transform_2, window_bounds = array<i64: 16, 256>}, {transform_indices = @transform_3, window_bounds = array<i64: 16, 256>}, {transform_indices = @transform_4, window_bounds = array<i64: 1, 8, 128>}]} {
    %c0 = arith.constant 0 : index
    %c0_0 = arith.constant 0 : index
    %0 = vector.load %arg3[%c0, %c0_0] : memref<16x256xf32, #tpu.memory_space<vmem>>, vector<16x256xf32>
    %c0_1 = arith.constant 0 : index
    %c0_2 = arith.constant 0 : index
    %1 = vector.load %arg4[%c0_1, %c0_2] : memref<16x256xf32, #tpu.memory_space<vmem>>, vector<16x256xf32>
    %2 = tpu.iota {dimensions = array<i32: 1>} : vector<16x256xi32>
    %3 = tpu.iota {dimensions = array<i32: 0>} : vector<16x256xi32>
    %c255_i32 = arith.constant 255 : i32
    %4 = tpu.dynamic_rotate %0 by %c255_i32 dim 1 : vector<16x256xf32>, i32 -> vector<16x256xf32>
    %5 = arith.subf %4, %0 : vector<16x256xf32>
    %c255_i32_3 = arith.constant 255 : i32
    %6 = tpu.dynamic_rotate %1 by %c255_i32_3 dim 1 : vector<16x256xf32>, i32 -> vector<16x256xf32>
    %7 = arith.mulf %6, %1 : vector<16x256xf32>
    %8 = arith.mulf %5, %7 : vector<16x256xf32>
    %9 = math.absf %8 : vector<16x256xf32>
    %c15_i32 = arith.constant 15 : i32
    %10 = vector.broadcast %c15_i32 : i32 to vector<16x256xi32>
    %11 = arith.andi %2, %10 : vector<16x256xi32>
    %c15_i32_4 = arith.constant 15 : i32
    %12 = vector.broadcast %c15_i32_4 : i32 to vector<16x256xi32>
    %13 = arith.cmpi slt, %11, %12 : vector<16x256xi32>
    %cst = arith.constant 0.000000e+00 : f32
    %14 = vector.broadcast %cst : f32 to vector<16x256xf32>
    %15 = arith.select %13, %9, %14 : vector<16x256xi1>, vector<16x256xf32>
    %16 = vector.shape_cast %15 : vector<16x256xf32> to vector<1x16x256xf32>
    %cst_5 = arith.constant dense<0.000000e+00> : vector<1xf32>
    %17 = vector.multi_reduction <add>, %16, %cst_5 [1, 2] : vector<1x16x256xf32> to vector<1xf32>
    %18 = vector.shape_cast %17 : vector<1xf32> to vector<1x1x1xf32>
    %19 = vector.extract %18[0, 0, 0] : f32 from vector<1x1x1xf32>
    %cst_6 = arith.constant 2.17013894E-5 : f32
    %20 = arith.mulf %19, %cst_6 : f32
    %c240_i32 = arith.constant 240 : i32
    %21 = tpu.dynamic_rotate %0 by %c240_i32 dim 1 : vector<16x256xf32>, i32 -> vector<16x256xf32>
    %22 = arith.subf %21, %0 : vector<16x256xf32>
    %c240_i32_7 = arith.constant 240 : i32
    %23 = tpu.dynamic_rotate %1 by %c240_i32_7 dim 1 : vector<16x256xf32>, i32 -> vector<16x256xf32>
    %24 = arith.mulf %23, %1 : vector<16x256xf32>
    %25 = arith.mulf %22, %24 : vector<16x256xf32>
    %26 = math.absf %25 : vector<16x256xf32>
    %c240_i32_8 = arith.constant 240 : i32
    %27 = vector.broadcast %c240_i32_8 : i32 to vector<16x256xi32>
    %28 = arith.cmpi slt, %2, %27 : vector<16x256xi32>
    %cst_9 = arith.constant 0.000000e+00 : f32
    %29 = vector.broadcast %cst_9 : f32 to vector<16x256xf32>
    %30 = arith.select %28, %26, %29 : vector<16x256xi1>, vector<16x256xf32>
    %31 = vector.shape_cast %30 : vector<16x256xf32> to vector<1x16x256xf32>
    %cst_10 = arith.constant dense<0.000000e+00> : vector<1xf32>
    %32 = vector.multi_reduction <add>, %31, %cst_10 [1, 2] : vector<1x16x256xf32> to vector<1xf32>
    %33 = vector.shape_cast %32 : vector<1xf32> to vector<1x1x1xf32>
    %34 = vector.extract %33[0, 0, 0] : f32 from vector<1x1x1xf32>
    %cst_11 = arith.constant 2.17013894E-5 : f32
    %35 = arith.mulf %34, %cst_11 : f32
    %36 = arith.addf %20, %35 : f32
    %c15_i32_12 = arith.constant 15 : i32
    %37 = tpu.dynamic_rotate %0 by %c15_i32_12 dim 0 : vector<16x256xf32>, i32 -> vector<16x256xf32>
    %38 = arith.subf %37, %0 : vector<16x256xf32>
    %c15_i32_13 = arith.constant 15 : i32
    %39 = tpu.dynamic_rotate %1 by %c15_i32_13 dim 0 : vector<16x256xf32>, i32 -> vector<16x256xf32>
    %40 = arith.mulf %39, %1 : vector<16x256xf32>
    %41 = arith.mulf %38, %40 : vector<16x256xf32>
    %42 = math.absf %41 : vector<16x256xf32>
    %c7_i32 = arith.constant 7 : i32
    %43 = vector.broadcast %c7_i32 : i32 to vector<16x256xi32>
    %44 = arith.andi %3, %43 : vector<16x256xi32>
    %c7_i32_14 = arith.constant 7 : i32
    %45 = vector.broadcast %c7_i32_14 : i32 to vector<16x256xi32>
    %46 = arith.cmpi slt, %44, %45 : vector<16x256xi32>
    %cst_15 = arith.constant 0.000000e+00 : f32
    %47 = vector.broadcast %cst_15 : f32 to vector<16x256xf32>
    %48 = arith.select %46, %42, %47 : vector<16x256xi1>, vector<16x256xf32>
    %49 = vector.shape_cast %48 : vector<16x256xf32> to vector<1x16x256xf32>
    %cst_16 = arith.constant dense<0.000000e+00> : vector<1xf32>
    %50 = vector.multi_reduction <add>, %49, %cst_16 [1, 2] : vector<1x16x256xf32> to vector<1xf32>
    %51 = vector.shape_cast %50 : vector<1xf32> to vector<1x1x1xf32>
    %52 = vector.extract %51[0, 0, 0] : f32 from vector<1x1x1xf32>
    %cst_17 = arith.constant 2.32514885E-5 : f32
    %53 = arith.mulf %52, %cst_17 : f32
    %54 = arith.addf %36, %53 : f32
    %55 = tpu.iota {dimensions = array<i32: 0>} : vector<8x128xi32>
    %c1_i32 = arith.constant 1 : i32
    %56 = vector.broadcast %c1_i32 : i32 to vector<8x128xi32>
    %57 = arith.cmpi eq, %55, %56 : vector<8x128xi32>
    %cst_18 = arith.constant 0.000000e+00 : f32
    %58 = vector.broadcast %54 : f32 to vector<8x128xf32>
    %59 = vector.broadcast %cst_18 : f32 to vector<8x128xf32>
    %60 = arith.select %57, %58, %59 : vector<8x128xi1>, vector<8x128xf32>
    %c0_19 = arith.constant 0 : index
    %c0_20 = arith.constant 0 : index
    %c0_21 = arith.constant 0 : index
    %61 = vector.load %arg5[%c0_19, %c0_20, %c0_21] : memref<1x8x128xf32, #tpu.memory_space<vmem>>, vector<1x8x128xf32>
    %62 = vector.shape_cast %61 : vector<1x8x128xf32> to vector<8x128xf32>
    %63 = vector.shape_cast %60 : vector<8x128xf32> to vector<1x8x128xf32>
    tpu.vector_store %arg5[%c0_19, %c0_20, %c0_21], %63 {strides = array<i32>} : memref<1x8x128xf32, #tpu.memory_space<vmem>>, vector<1x8x128xf32>,
    %c1_i32_22 = arith.constant 1 : i32
    %64 = arith.cmpi slt, %arg0, %c1_i32_22 : i32
    %65 = arith.extui %64 : i1 to i32
    %c0_i32 = arith.constant 0 : i32
    %66 = arith.cmpi ne, %65, %c0_i32 : i32
    scf.if %66 {
      %c0_23 = arith.constant 0 : index
      %c0_24 = arith.constant 0 : index
      %67 = vector.load %arg1[%c0_23, %c0_24] : memref<16x256xf32, #tpu.memory_space<vmem>>, vector<16x256xf32>
      %c0_25 = arith.constant 0 : index
      %c0_26 = arith.constant 0 : index
      %68 = vector.load %arg2[%c0_25, %c0_26] : memref<16x256xf32, #tpu.memory_space<vmem>>, vector<16x256xf32>
      %cst_27 = arith.constant 0.000000e+00 : f32
      %69 = vector.broadcast %cst_27 : f32 to vector<16x256xf32>
      %70 = arith.maximumf %67, %69 : vector<16x256xf32>
      %71 = arith.mulf %67, %68 : vector<16x256xf32>
      %72 = arith.subf %70, %71 : vector<16x256xf32>
      %73 = math.absf %67 : vector<16x256xf32>
      %cst_28 = arith.constant 0.000000e+00 : f32
      %74 = vector.broadcast %cst_28 : f32 to vector<16x256xf32>
      %75 = arith.subf %74, %73 : vector<16x256xf32>
      %76 = math.exp %75 : vector<16x256xf32>
      %cst_29 = arith.constant 1.000000e+00 : f32
      %77 = vector.broadcast %cst_29 : f32 to vector<16x256xf32>
      %78 = arith.addf %77, %76 : vector<16x256xf32>
      %79 = math.log %78 : vector<16x256xf32>
      %80 = arith.addf %72, %79 : vector<16x256xf32>
      %c0_30 = arith.constant 0 : index
      %c0_31 = arith.constant 0 : index
      %c0_32 = arith.constant 0 : index
      %81 = vector.load %arg5[%c0_30, %c0_31, %c0_32] : memref<1x8x128xf32, #tpu.memory_space<vmem>>, vector<1x8x128xf32>
      %82 = vector.shape_cast %81 : vector<1x8x128xf32> to vector<8x128xf32>
      %c0_i32_33 = arith.constant 0 : i32
      %83 = vector.broadcast %c0_i32_33 : i32 to vector<8x128xi32>
      %84 = arith.cmpi eq, %55, %83 : vector<8x128xi32>
      %85 = vector.shape_cast %80 : vector<16x256xf32> to vector<1x16x256xf32>
      %cst_34 = arith.constant dense<0.000000e+00> : vector<1xf32>
      %86 = vector.multi_reduction <add>, %85, %cst_34 [1, 2] : vector<1x16x256xf32> to vector<1xf32>
      %87 = vector.shape_cast %86 : vector<1xf32> to vector<1x1x1xf32>
      %88 = vector.extract %87[0, 0, 0] : f32 from vector<1x1x1xf32>
      %cst_35 = arith.constant 0.000000e+00 : f32
      %89 = vector.broadcast %88 : f32 to vector<8x128xf32>
      %90 = vector.broadcast %cst_35 : f32 to vector<8x128xf32>
      %91 = arith.select %84, %89, %90 : vector<8x128xi1>, vector<8x128xf32>
      %92 = arith.addf %82, %91 : vector<8x128xf32>
      %c0_36 = arith.constant 0 : index
      %c0_37 = arith.constant 0 : index
      %c0_38 = arith.constant 0 : index
      %93 = vector.load %arg5[%c0_36, %c0_37, %c0_38] : memref<1x8x128xf32, #tpu.memory_space<vmem>>, vector<1x8x128xf32>
      %94 = vector.shape_cast %93 : vector<1x8x128xf32> to vector<8x128xf32>
      %95 = vector.shape_cast %92 : vector<8x128xf32> to vector<1x8x128xf32>
      tpu.vector_store %arg5[%c0_36, %c0_37, %c0_38], %95 {strides = array<i32>} : memref<1x8x128xf32, #tpu.memory_space<vmem>>, vector<1x8x128xf32>,
    } else {
    }
    return
  }
  func.func @transform_0(%arg0: i32) -> (i32, i32) {
    %c0_i32 = arith.constant 0 : i32
    %0 = arith.minsi %arg0, %c0_i32 : i32
    %c0_i32_0 = arith.constant 0 : i32
    %c0_i32_1 = arith.constant 0 : i32
    return %0, %c0_i32_0 : i32, i32
  }
  func.func @transform_1(%arg0: i32) -> (i32, i32) {
    %c0_i32 = arith.constant 0 : i32
    %0 = arith.minsi %arg0, %c0_i32 : i32
    %c0_i32_0 = arith.constant 0 : i32
    %c0_i32_1 = arith.constant 0 : i32
    return %0, %c0_i32_0 : i32, i32
  }
  func.func @transform_2(%arg0: i32) -> (i32, i32) {
    %c0_i32 = arith.constant 0 : i32
    %c0_i32_0 = arith.constant 0 : i32
    return %arg0, %c0_i32 : i32, i32
  }
  func.func @transform_3(%arg0: i32) -> (i32, i32) {
    %c0_i32 = arith.constant 0 : i32
    %c0_i32_0 = arith.constant 0 : i32
    return %arg0, %c0_i32 : i32, i32
  }
  func.func @transform_4(%arg0: i32) -> (i32, i32, i32) {
    %c0_i32 = arith.constant 0 : i32
    %c0_i32_0 = arith.constant 0 : i32
    %c0_i32_1 = arith.constant 0 : i32
    return %arg0, %c0_i32, %c0_i32_0 : i32, i32, i32
  }
}

</mosaic_0001>

<bundles_post_ra>
// kernel: zoning_aware_loss.1
= control target key start
LH: loop header
LB: loop body
LE: loop exit
PB: predicated region body
PF: predicated region fallthrough
CT: control target
= control target key end

     0   :  { %s757_s15 = smov 0   ;;  %s965_s0 = inlined_call_operand.vmem [shape: f32[16,256], index: 0, kind: input, shape index: {}]   ;;  %s966_s1 = inlined_call_operand.vmem [shape: f32[16,256], index: 1, kind: input, shape index: {}]   ;;  %s967_s2 = inlined_call_operand.vmem [shape: f32[64,256], index: 2, kind: input, shape index: {}]   ;;  %s968_s3 = inlined_call_operand.vmem [shape: f32[64,256], index: 3, kind: input, shape index: {}]   ;;  %s969_s4 = inlined_call_operand.vmem [shape: f32[4,8,128], index: 4, kind: output, shape index: {}]  }
   0x1 LB: > { %s763_s16 = sadd.s32 4294967295, %s728_s15   ;;  %p667_p0 = scmp.ge.s32.totalorder %s728_s15, 1  ;;  %s728_s15 = sphi %s757_s15, %s14_s15  }
   0x2   : > { %p216_p1 = scmp.lt.s32.totalorder %s728_s15, 5 }
   0x4   : > { %p217_p2 = pnand %p667_p0, %p216_p1 }
   0x5   : > { %s674_s17 = sshll.u32 (!%p217_p2), %s763_s16, 1  ;;  %s730_s25 = smov (!%p217_p2), 127  }
   0x6   : > { %220 = sbr.rel (%p217_p2) target bundleno = 632 (0x278), region = 36  ;;  %p287_p3 = scmp.lt.s32.totalorder (!%p217_p2), %s674_s17, 7 }
   0x7   : > { %s731_s26 = smov (!%p217_p2), 112   ;;  %p264_p4 = scmp.lt.s32.totalorder (!%p217_p2), %s763_s16, 0 }
   0x8   : > { %p300_p6 = scmp.lt.s32.totalorder (!%p217_p2), %s763_s16, 3  ;;  %p681_p7 = scmp.ge.s32.totalorder (!%p217_p2), %s763_s16, 1 }
   0xb   : > { %s977_s17 = smov (!%p287_p3, %s674_s17), 7  ;;  %v312_v8 = vlaneseq }
   0xc   : > { %s686_s18 = sshll.u32 %s977_s17, 4 }
   0xd   : > { %s298_s21 = scalar_lea.vmem %s968_s3, %s686_s18  ;;  %s291_s24 = scalar_lea.vmem %s967_s2, %s686_s18  ;;  %v806_v9 = vshrl.u32 %v312_v8, 7  ;;  %v808_v10 = vand.u32 127, %v312_v8 }
   0xe   : > { %v774_v0 = vld [vmem:[%s298_s21] sm:$0xff]  ;;  %v780_v2 = vld [vmem:[%s298_s21 + $0x8] sm:$0xff]  ;;  %v790_v4 = vld [vmem:[%s291_s24 + $0x18] sm:$0xff]  ;;  %s265_s27 = scalar_select %p264_p4, %s763_s16, 0 }
   0xf   : > { %v776_v1 = vld [vmem:[%s291_s24] sm:$0xff]  ;;  %335 = vrot.lane.b32.xlu1 %v774_v0, %s730_s25  ;;  %v782_v3 = vld [vmem:[%s291_s24 + $0x8] sm:$0xff]  ;;  %v792_v5 = vld [vmem:[%s291_s24 + $0x10] sm:$0xff]  ;;  %v444_v16 = vrot.slane %v790_v4, 1  ;;  %vm445_vm0 = vcmp.lt.s32.totalorder %v806_v9, 7  ;;  %v454_v17 = vrot.slane %v774_v0, 1 }
  0x10   : > { %318 = vrot.lane.b32.xlu0 %v776_v1, %s730_s25  ;;  %v796_v6 = vld [vmem:[%s298_s21 + $0x18] sm:$0xff]  ;;  %v798_v7 = vld [vmem:[%s298_s21 + $0x10] sm:$0xff]  ;;  %v441_v11 = vrot.slane %v776_v1, 1  ;;  %v442_v14 = vrot.slane %v782_v3, 1  ;;  %v443_v15 = vrot.slane %v792_v5, 1  ;;  %v455_v18 = vrot.slane %v780_v2, 1 }
  0x11   : > { %v456_v19 = vrot.slane %v798_v7, 1  ;;  %v457_v20 = vrot.slane %v796_v6, 1  ;;  %vm326_vm1 = vcmp.lt.s32.totalorder %v808_v10, 127  ;;  %v845_v39 = vadd.s32 128, %v808_v10  ;;  %s668_s28 = sshll.u32 %s265_s27, 1 }
  0x12   : > { %v446_v23 = vsel %vm445_vm0, %v441_v11, %v443_v15  ;;  %v447_v24 = vsel %vm445_vm0, %v442_v14, %v444_v16  ;;  %v448_v27 = vsel %vm445_vm0, %v443_v15, %v441_v11  ;;  %v317_v41 = vadd.s32 8, %v806_v9  ;;  %p267_p5 = scmp.lt.s32.totalorder %s668_s28, 1 }
  0x13   : > { %339 = vrot.lane.b32.xlu1 %v780_v2, %s730_s25  ;;  %v458_v25 = vsel %vm445_vm0, %v454_v17, %v456_v19  ;;  %v459_v26 = vsel %vm445_vm0, %v455_v18, %v457_v20  ;;  %v450_v28 = vsub.f32 %v446_v23, %v776_v1  ;;  %v451_v29 = vsub.f32 %v447_v24, %v782_v3  ;;  %s301_s11 = scalar_select %p300_p6, %s763_s16, 3 }
  0x14   : > { %322 = vrot.lane.b32.xlu0 %v782_v3, %s730_s25  ;;  %v460_v30 = vsel %vm445_vm0, %v456_v19, %v454_v17  ;;  %v462_v35 = vmul.f32 %v458_v25, %v774_v0  ;;  %v463_v36 = vmul.f32 %v459_v26, %v780_v2  ;;  %v452_v40 = vsub.f32 %v448_v27, %v792_v5  ;;  %s979_s28 = smov (!%p267_p5, %s668_s28), 1 }
  0x15   : > { %v449_v42 = vsel %vm445_vm0, %v444_v16, %v442_v14  ;;  %v461_v43 = vsel %vm445_vm0, %v457_v20, %v455_v18  ;;  %v464_v44 = vmul.f32 %v460_v30, %v798_v7  ;;  %v359_v47 = vand.u32 15, %v808_v10  ;;  %s684_s29 = sshll.u32 %s979_s28, 4  ;;  %s680_s18 = sshll.u32 %s301_s11, 3 }
  0x16   : > { %v466_v52 = vmul.f32 %v462_v35, %v450_v28  ;;  %v467_v53 = vmul.f32 %v463_v36, %v451_v29  ;;  %v360_v54 = vand.u32 15, %v845_v39  ;;  %v453_v55 = vsub.f32 %v449_v42, %v790_v4  ;;  %s934_s6 = scalar_lea.vmem %s965_s0, %s684_s29  ;;  %s939_s9 = scalar_lea.vmem %s966_s1, %s684_s29 }
  0x17   : > { %384 = vrot.lane.b32.xlu1 %v782_v3, %s731_s26  ;;  %v465_v56 = vmul.f32 %v461_v43, %v796_v6  ;;  %v474_v57 = vand.u32 7, %v806_v9  ;;  %v468_v58 = vmul.f32 %v464_v44, %v452_v40  ;;  %v475_v59 = vand.u32 7, %v317_v41  ;;  %s947_s24 = scalar_lea.vmem %s969_s4, %s680_s18 }
  0x18   : > { %380 = vrot.lane.b32.xlu0 %v776_v1, %s731_s26  ;;  %vm388_vm2 = vcmp.lt.s32.totalorder %v808_v10, 112  ;;  %vm864_vm3 = vcmp.lt.s32.totalorder %v359_v47, 15  ;;  %vm872_vm4 = vcmp.lt.s32.totalorder %v360_v54, 15  ;;  %vm422_vm7 = vcmp.lt.s32.totalorder %v845_v39, 240 }
  0x19   : > { %v469_v16 = vmul.f32 %v465_v56, %v453_v55  ;;  %vm476_vm5 = vcmp.lt.s32.totalorder %v474_v57, 7  ;;  %v472_v19 = vand.u32 2147483647, %v468_v58  ;;  %vm880_vm6 = vcmp.lt.s32.totalorder %v475_v59, 7 }
  0x1a   : > { %vm496_vm8 = vcmp.eq.s32.totalorder %v806_v9, 1 }
  0x1b   : > { %401 = vrot.lane.b32.xlu1 %v780_v2, %s731_s26 }
  0x1c   : > { %397 = vrot.lane.b32.xlu0 %v774_v0, %s731_s26 }
  0x1f   : > { %324 = vrot.lane.b32.xlu1 %v790_v4, %s730_s25 }
  0x20   : > { %320 = vrot.lane.b32.xlu0 %v792_v5, %s730_s25 }
  0x23   : > { %341 = vrot.lane.b32.xlu1 %v796_v6, %s730_s25 }
  0x24   : > { %337 = vrot.lane.b32.xlu0 %v798_v7, %s730_s25 }
  0x27   : > { %386 = vrot.lane.b32.xlu1 %v790_v4, %s731_s26 }
  0x28   : > { %382 = vrot.lane.b32.xlu0 %v792_v5, %s731_s26 }
  0x2b   : > { %403 = vrot.lane.b32.xlu1 %v796_v6, %s731_s26 }
  0x2c   : > { %399 = vrot.lane.b32.xlu0 %v798_v7, %s731_s26 }
  0x81   : > { %v336_v12 = vpop.permute.xlu1 %335 }
  0x82   : > { %v319_v13 = vpop.permute.xlu0 %318 }
  0x85   : > { %v340_v21 = vpop.permute.xlu1 %339 }
  0x86   : > { %v323_v22 = vpop.permute.xlu0 %322  ;;  %v343_v31 = vsel %vm326_vm1, %v336_v12, %v340_v21  ;;  %v345_v37 = vsel %vm326_vm1, %v340_v21, %v336_v12  ;;  %v470_v12 = vand.u32 2147483647, %v466_v52 }
  0x87   : > { %v327_v32 = vsel %vm326_vm1, %v319_v13, %v323_v22  ;;  %v329_v38 = vsel %vm326_vm1, %v323_v22, %v319_v13  ;;  %v347_v45 = vmul.f32 %v343_v31, %v774_v0  ;;  %v348_v48 = vmul.f32 %v345_v37, %v780_v2 }
  0x88   : > { %v331_v46 = vsub.f32 %v327_v32, %v776_v1  ;;  %v332_v49 = vsub.f32 %v329_v38, %v782_v3  ;;  %v471_v13 = vand.u32 2147483647, %v467_v53  ;;  %v478_v29 = vsel %vm476_vm5, %v470_v12, 0.0 }
  0x89   : > { %v385_v33 = vpop.permute.xlu1 %384  ;;  %v473_v38 = vand.u32 2147483647, %v469_v16 }
  0x8a   : > { %v381_v34 = vpop.permute.xlu0 %380  ;;  %v351_v60 = vmul.f32 %v347_v45, %v331_v46  ;;  %v352_v62 = vmul.f32 %v348_v48, %v332_v49  ;;  %v479_v30 = vsel %vm476_vm5, %v471_v13, 0.0  ;;  %v480_v46 = vsel %vm880_vm6, %v472_v19, 0.0 }
  0x8b   : > { %v389_v17 = vsel %vm388_vm2, %v381_v34, %v385_v33  ;;  %v391_v18 = vsel %vm388_vm2, %v385_v33, %v381_v34  ;;  %v481_v57 = vsel %vm880_vm6, %v473_v38, 0.0 }
  0x8c   : > { %v355_v21 = vand.u32 2147483647, %v351_v60  ;;  %v356_v25 = vand.u32 2147483647, %v352_v62  ;;  %v393_v31 = vsub.f32 %v389_v17, %v776_v1  ;;  %v394_v32 = vsub.f32 %v391_v18, %v782_v3 }
  0x8d   : > { %v402_v50 = vpop.permute.xlu1 %401  ;;  %v482_v3 = vadd.f32 %v479_v30, %v478_v29 }
  0x8e   : > { %v398_v51 = vpop.permute.xlu0 %397  ;;  %v363_v1 = vsel %vm864_vm3, %v355_v21, 0.0  ;;  %v364_v45 = vsel %vm872_vm4, %v356_v25, 0.0 }
  0x8f   : > { %v407_v63 = vsel %vm388_vm2, %v402_v50, %v398_v51  ;;  %v405_v14 = vsel %vm388_vm2, %v398_v51, %v402_v50  ;;  %v367_v52 = vadd.f32 %v364_v45, %v363_v1  ;;  %v483_v58 = vadd.f32 %v482_v3, %v480_v46 }
  0x90   : > { %v410_v22 = vmul.f32 %v407_v63, %v780_v2  ;;  %v409_v26 = vmul.f32 %v405_v14, %v774_v0 }
  0x91   : > { %v325_v8 = vpop.permute.xlu1 %324  ;;  %v484_v10 = vadd.f32 %v483_v58, %v481_v57 }
  0x92   : > { %v321_v11 = vpop.permute.xlu0 %320  ;;  %v414_v37 = vmul.f32 %v410_v22, %v394_v32  ;;  %v413_v40 = vmul.f32 %v409_v26, %v393_v31 }
  0x93   : > { %v328_v23 = vsel %vm326_vm1, %v321_v11, %v325_v8  ;;  %v330_v24 = vsel %vm326_vm1, %v325_v8, %v321_v11 }
  0x94   : > { %v333_v34 = vsub.f32 %v328_v23, %v792_v5  ;;  %v334_v35 = vsub.f32 %v330_v24, %v790_v4  ;;  %v418_v50 = vand.u32 2147483647, %v414_v37  ;;  %v417_v53 = vand.u32 2147483647, %v413_v40 }
  0x95   : > { %v342_v27 = vpop.permute.xlu1 %341 }
  0x96   : > { %v338_v28 = vpop.permute.xlu0 %337 }
  0x97   : > { %v344_v2 = vsel %vm326_vm1, %v338_v28, %v342_v27  ;;  %v346_v33 = vsel %vm326_vm1, %v342_v27, %v338_v28 }
  0x98   : > { %v349_v0 = vmul.f32 %v344_v2, %v798_v7  ;;  %v350_v36 = vmul.f32 %v346_v33, %v796_v6 }
  0x99   : > { %v387_v43 = vpop.permute.xlu1 %386 }
  0x9a   : > { %v353_v41 = vmul.f32 %v349_v0, %v333_v34  ;;  %v354_v42 = vmul.f32 %v350_v36, %v334_v35  ;;  %v383_v44 = vpop.permute.xlu0 %382 }
  0x9b   : > { %v390_v48 = vsel %vm388_vm2, %v383_v44, %v387_v43  ;;  %v392_v51 = vsel %vm388_vm2, %v387_v43, %v383_v44 }
  0x9c   : > { %v357_v47 = vand.u32 2147483647, %v353_v41  ;;  %v358_v49 = vand.u32 2147483647, %v354_v42  ;;  %v395_v59 = vsub.f32 %v390_v48, %v792_v5  ;;  %v396_v8 = vsub.f32 %v392_v51, %v790_v4 }
  0x9d   : > { %v404_v54 = vpop.permute.xlu1 %403  ;;  %v424_v5 = vsel %vm422_vm7, %v418_v50, 0.0 }
  0x9e   : > { %v400_v55 = vpop.permute.xlu0 %399  ;;  %v365_v56 = vsel %vm864_vm3, %v357_v47, 0.0  ;;  %v366_v12 = vsel %vm872_vm4, %v358_v49, 0.0  ;;  %v427_v4 = vadd.f32 %v424_v5, %v417_v53 }
  0x9f   : > { %v406_v60 = vsel %vm388_vm2, %v400_v55, %v404_v54  ;;  %v408_v62 = vsel %vm388_vm2, %v404_v54, %v400_v55  ;;  %v368_v63 = vadd.f32 %v367_v52, %v365_v56 }
  0xa0   : > { %v411_v11 = vmul.f32 %v406_v60, %v798_v7  ;;  %v412_v61 = vmul.f32 %v408_v62, %v796_v6 }
  0xa1   : > { %v369_v13 = vadd.f32 %v368_v63, %v366_v12 }
  0xa2   : > { %v415_v14 = vmul.f32 %v411_v11, %v395_v59  ;;  %v416_v16 = vmul.f32 %v412_v61, %v396_v8 }
  0xa3   : > { %370 = vadd.xlane.f32.xlu0 %v369_v13 }
  0xa4   : > { %v419_v17 = vand.u32 2147483647, %v415_v14  ;;  %v420_v18 = vand.u32 2147483647, %v416_v16 }
  0xa6   : > { %v426_v7 = vsel %vm422_vm7, %v420_v18, 0.0  ;;  %v428_v6 = vadd.f32 %v427_v4, %v419_v17 }
  0xa7   : > { %485 = vadd.xlane.f32.xlu0 %v484_v10 }
  0xa8   : > { %v429_v15 = vadd.f32 %v428_v6, %v426_v7 }
  0xaa   : > { %430 = vadd.xlane.f32.xlu1 %v429_v15 }
 0x12c   : > { %v371_v39 = vpop.xlane.xlu0 %370 }
 0x12d   : > { %v372_v19 = vrot.slane %v371_v39, 4 }
 0x12f   : > { %v373_v20 = vadd.f32 %v372_v19, %v371_v39 }
 0x130   : > { %v486_v21 = vpop.xlane.xlu0 %485 }
 0x131   : > { %v374_v22 = vrot.slane %v373_v20, 2  ;;  %v487_v23 = vrot.slane %v486_v21, 4 }
 0x133   : > { %v488_v24 = vadd.f32 %v487_v23, %v486_v21  ;;  %v431_v25 = vpop.xlane.xlu1 %430  ;;  %v375_v26 = vadd.f32 %v374_v22, %v373_v20 }
 0x134   : > { %v432_v27 = vrot.slane %v431_v25, 4 }
 0x135   : > { %v489_v28 = vrot.slane %v488_v24, 2  ;;  %v376_v29 = vrot.slane %v375_v26, 1 }
 0x136   : > { %v433_v30 = vadd.f32 %v432_v27, %v431_v25 }
 0x137   : > { %v490_v31 = vadd.f32 %v489_v28, %v488_v24  ;;  %v377_v32 = vadd.f32 %v376_v29, %v375_v26 }
 0x138   : > { %v434_v2 = vrot.slane %v433_v30, 2 }
 0x139   : > { %688 = vpush %v377_v32  ;;  %v491_v34 = vrot.slane %v490_v31, 1 }
 0x13a   : > { %v435_v33 = vadd.f32 %v434_v2, %v433_v30 }
 0x13b   : > { %v492_v36 = vadd.f32 %v491_v34, %v490_v31 }
 0x13c   : > { %v436_v35 = vrot.slane %v435_v33, 1 }
 0x13e   : > { %v437_v0 = vadd.f32 %v436_v35, %v435_v33 }
 0x140   : > { %690 = vpush %v437_v0 }
 0x141   : > { %692 = vpush %v492_v36 }
 0x16a   : > { %s689_s10 = spop %688 }
 0x16b   : > { %s379_s12 = smul.f32 2.170139e-05, %s689_s10 }
 0x171   : > { %s691_s13 = spop %690 }
 0x172   : > { %s439_s14 = smul.f32 2.170139e-05, %s691_s13  ;;  %s693_s17 = spop %692 }
 0x173   : > { %s494_s20 = smul.f32 2.3251489e-05, %s693_s17 }
 0x174   : > { %s440_s19 = sadd.f32 %s439_s14, %s379_s12 }
 0x176   : > { %s495_s21 = sadd.f32 %s494_s20, %s440_s19  ;;  %503 = sbr.rel (%p681_p7) target bundleno = 632 (0x278), region = 40 }
 0x178   : > { %v497_v37 = vstv %s495_s21 }
 0x179   : > { %v498_v1 = vsel %vm496_vm8, %v497_v37, 0.0 }
 0x17a   : > { %499 = vst [vmem:[%s947_s24] sm:$0xff] %v498_v1 }
 0x17b   : > { %v504_v38 = vld [vmem:[%s934_s6] sm:$0xff]  ;;  %v505_v3 = vld [vmem:[%s934_s6 + $0x8] sm:$0xff]  ;;  %v506_v40 = vld [vmem:[%s934_s6 + $0x10] sm:$0xff]  ;;  %vm557_vm9 = vcmp.eq.s32.totalorder %v806_v9, 0 }
 0x17c   : > { %v507_v41 = vld [vmem:[%s934_s6 + $0x18] sm:$0xff]  ;;  %v524_v42 = vand.u32 2147483647, %v504_v38  ;;  %v525_v43 = vand.u32 2147483647, %v505_v3  ;;  %v508_v63 = vld [vmem:[%s939_s9] sm:$0xff] }
 0x17d   : > { %v526_v44 = vand.u32 2147483647, %v506_v40  ;;  %v527_v45 = vand.u32 2147483647, %v507_v41  ;;  %v509_v8 = vld [vmem:[%s939_s9 + $0x8] sm:$0xff]  ;;  %v510_v11 = vld [vmem:[%s939_s9 + $0x10] sm:$0xff]  ;;  %v516_v13 = vmul.f32 %v508_v63, %v504_v38 }
 0x17e   : > { %v528_v46 = vsub.f32 0.0, %v524_v42  ;;  %v529_v47 = vsub.f32 0.0, %v525_v43  ;;  %v511_v61 = vld [vmem:[%s939_s9 + $0x18] sm:$0xff]  ;;  %v512_v12 = vmax.f32 %v504_v38, 0.0  ;;  %v513_v5 = vmax.f32 %v505_v3, 0.0 }
 0x17f   : > { %v530_v48 = vsub.f32 0.0, %v526_v44  ;;  %v531_v49 = vsub.f32 0.0, %v527_v45  ;;  %v517_v14 = vmul.f32 %v509_v8, %v505_v3  ;;  %v514_v16 = vmax.f32 %v506_v40, 0.0 }
 0x180   : > { %v532_v50 = vmul.f32 1.442695, %v528_v46  ;;  %v534_v51 = vmul.f32 1.442695, %v529_v47  ;;  %v518_v10 = vmul.f32 %v510_v11, %v506_v40  ;;  %v515_v17 = vmax.f32 %v507_v41, 0.0 }
 0x181   : > { %v536_v52 = vmul.f32 1.442695, %v530_v48  ;;  %v538_v53 = vmul.f32 1.442695, %v531_v49  ;;  %v519_v18 = vmul.f32 %v511_v61, %v507_v41  ;;  %v520_v4 = vsub.f32 %v512_v12, %v516_v13  ;;  %v556_v1 = vld [vmem:[%s947_s24] sm:$0xff] }
 0x182   : > { %706 = vpow2.f32 %v532_v50  ;;  %v521_v6 = vsub.f32 %v513_v5, %v517_v14  ;;  %v522_v39 = vsub.f32 %v514_v16, %v518_v10 }
 0x183   : > { %708 = vpow2.f32 %v534_v51  ;;  %v523_v21 = vsub.f32 %v515_v17, %v519_v18 }
 0x184   : > { %710 = vpow2.f32 %v536_v52 }
 0x185   : > { %712 = vpow2.f32 %v538_v53 }
 0x18f   : > { %v707_v54 = vpop.eup %706 }
 0x190   : > { %v709_v55 = vpop.eup %708  ;;  %v540_v56 = vadd.f32 1.0, %v707_v54 }
 0x191   : > { %v711_v57 = vpop.eup %710  ;;  %v541_v58 = vadd.f32 1.0, %v709_v55 }
 0x192   : > { %v713_v59 = vpop.eup %712  ;;  %v542_v60 = vadd.f32 1.0, %v711_v57  ;;  %714 = vlog2.f32 %v540_v56 }
 0x193   : > { %v543_v62 = vadd.f32 1.0, %v713_v59  ;;  %716 = vlog2.f32 %v541_v58 }
 0x194   : > { %718 = vlog2.f32 %v542_v60 }
 0x195   : > { %720 = vlog2.f32 %v543_v62 }
 0x19f   : > { %v715_v7 = vpop.eup %714 }
 0x1a0   : > { %v717_v15 = vpop.eup %716  ;;  %v545_v19 = vmul.f32 0.6931472, %v715_v7 }
 0x1a1   : > { %v719_v20 = vpop.eup %718  ;;  %v547_v22 = vmul.f32 0.6931472, %v717_v15 }
 0x1a2   : > { %v721_v23 = vpop.eup %720  ;;  %v549_v24 = vmul.f32 0.6931472, %v719_v20  ;;  %v552_v25 = vadd.f32 %v545_v19, %v520_v4 }
 0x1a3   : > { %v551_v26 = vmul.f32 0.6931472, %v721_v23  ;;  %v553_v27 = vadd.f32 %v547_v22, %v521_v6 }
 0x1a4   : > { %v554_v28 = vadd.f32 %v549_v24, %v522_v39 }
 0x1a5   : > { %v555_v29 = vadd.f32 %v551_v26, %v523_v21  ;;  %v558_v30 = vadd.f32 %v553_v27, %v552_v25 }
 0x1a7   : > { %v559_v31 = vadd.f32 %v558_v30, %v554_v28 }
 0x1a9   : > { %v560_v32 = vadd.f32 %v559_v31, %v555_v29 }
 0x1ab   : > { %561 = vadd.xlane.f32.xlu0 %v560_v32 }
 0x234   : > { %v562_v2 = vpop.xlane.xlu0 %561 }
 0x235   : > { %v563_v33 = vrot.slane %v562_v2, 4 }
 0x237   : > { %v564_v34 = vadd.f32 %v563_v33, %v562_v2 }
 0x239   : > { %v565_v35 = vrot.slane %v564_v34, 2 }
 0x23b   : > { %v566_v0 = vadd.f32 %v565_v35, %v564_v34 }
 0x23d   : > { %v567_v36 = vrot.slane %v566_v0, 1 }
 0x23f   : > { %v568_v37 = vadd.f32 %v567_v36, %v566_v0 }
 0x241   : > { %694 = vpush %v568_v37 }
 0x272   : > { %s695_s16 = spop %694 }
 0x273   : > { %v570_v38 = vstv %s695_s16 }
 0x274   : > { %v571_v3 = vsel %vm557_vm9, %v570_v38, 0.0 }
 0x275   : > { %v572_v40 = vadd.f32 %v571_v3, %v556_v1 }
 0x277   : > { %573 = vst [vmem:[%s947_s24] sm:$0xff] %v572_v40 }
 0x278 PF: > { %s14_s15 = sadd.s32 1, %s728_s15  }
 0x279   : > { %p11_p8 = scmp.ge.s32.totalorder %s14_s15, 6  }
 0x27b   :  { %13 = sbr.rel (!%p11_p8) target bundleno = 1 (0x1), region = 79 }

</bundles_post_ra>
